<compile_context>
chip_gen: v7x
topology: tpu7x:2x2x1
jax: 0.10.0
libtpu: 0.0.40
codegen_flags: <defaults>
</compile_context>

<pallas_src>
import jax
import jax.numpy as jnp
import numpy as np
from jax.experimental import pallas as pl
from jax.experimental.pallas import tpu as pltpu

LANE = 128              # vreg lane width
SUBLANE = 8             # vreg sublane count (f32)
_PALLAS_MIN_N = 1 << 14  # below this, launch overhead dominates -> fused jnp


def _round_up(v: int, m: int) -> int:
    return ((v + m - 1) // m) * m


def _chip_defaults():
    """Best-effort per-generation tuning; safe fallbacks if detection fails."""
    num_partials, tile_rows_max, vmem_limit = 1, 4096, None  # v5e / unknown
    try:
        kind = jax.devices()[0].device_kind.lower()
    except Exception:
        return num_partials, tile_rows_max, vmem_limit
    if "v7" in kind or "7x" in kind:
        # 2 TensorCores/chip, 64 MiB physical VMEM, 3.2 TB/s HBM.
        num_partials, tile_rows_max, vmem_limit = 2, 8192, 48 << 20
    elif "v6" in kind:
        # 1 TensorCore, 128 MiB VMEM, 1.4 TB/s HBM.
        num_partials, tile_rows_max, vmem_limit = 1, 8192, 64 << 20
    return num_partials, tile_rows_max, vmem_limit


def _make_dot_kernel(tile_rows: int, rows_total: int, steps_per_partial: int,
                     needs_mask: bool):
    """Kernel: resident (8,128) f32 accumulator per partial, VPU-only adds."""
    group = tile_rows // SUBLANE

    def kernel(x_ref, h_ref, o_ref):
        r = pl.program_id(1)

        @pl.when(r == 0)
        def _():
            o_ref[...] = jnp.zeros_like(o_ref)

        # Native-dtype DMA; upcast to f32 in-vreg (halves HBM bytes for bf16).
        prod = x_ref[...].astype(jnp.float32) * h_ref[...].astype(jnp.float32)

        if needs_mask:
            # Mask rows beyond the true array: covers the partial last tile
            # (undefined DMA tail) and fully-OOB logical tiles (clamped DMA).
            blk = pl.program_id(0) * steps_per_partial + r
            row_ids = blk * tile_rows + jax.lax.broadcasted_iota(
                jnp.int32, prod.shape, 0)
            prod = jnp.where(row_ids < rows_total, prod, 0.0)

        # Row-group partial sums: pure VPU vreg adds into the resident
        # output block; no per-step cross-lane/cross-sublane reduce.
        o_ref[...] += prod.reshape(group, SUBLANE, LANE).sum(axis=0)

    return kernel


def _pallas_dot(x: jax.Array, h: jax.Array,
                tile_rows_max: int | None = None,
                num_partials: int | None = None) -> jax.Array:
    """sum(x * h) via a tiled Pallas reduction; returns shape (1,) f32."""
    n = x.shape[0]
    dflt_partials, dflt_tile, vmem_limit = _chip_defaults()
    if tile_rows_max is None:
        tile_rows_max = dflt_tile
    if num_partials is None:
        num_partials = dflt_partials

    # Lane alignment: free reshape when N is 128-aligned; otherwise a small
    # zero pad to the next 128 (>=1024 for very small N) boundary.
    n_pad = max(_round_up(n, LANE), SUBLANE * LANE)
    if n_pad != n:
        x = jnp.pad(x, (0, n_pad - n))
        h = jnp.pad(h, (0, n_pad - n))
    rows = n_pad // LANE
    x2 = x.reshape(rows, LANE)
    h2 = h.reshape(rows, LANE)

    # Balanced tiles (never pad rows up to a full tile multiple).
    num_tiles = pl.cdiv(rows, tile_rows_max)
    tile_rows = _round_up(pl.cdiv(rows, num_tiles), SUBLANE)
    tile_rows = max(SUBLANE, min(tile_rows, (rows // SUBLANE) * SUBLANE))
    num_blocks = pl.cdiv(rows, tile_rows)
    num_partials = max(1, min(num_partials, num_blocks))
    steps = pl.cdiv(num_blocks, num_partials)
    needs_mask = (num_partials * steps * tile_rows) != rows
    last_blk = num_blocks - 1

    def in_map(c, r):
        # Clamp fully-out-of-range logical tiles onto the last valid tile;
        # the in-kernel row mask zeroes their contribution.
        return (jnp.minimum(c * steps + r, last_blk), 0)

    kernel = _make_dot_kernel(tile_rows, rows, steps, needs_mask)

    itemsize = jnp.dtype(x.dtype).itemsize
    cost = pl.CostEstimate(
        flops=2 * n,
        transcendentals=0,
        bytes_accessed=2 * n * itemsize + num_partials * SUBLANE * LANE * 4)

    partials = pl.pallas_call(
        kernel,
        out_shape=jax.ShapeDtypeStruct((num_partials * SUBLANE, LANE),
                                       jnp.float32),
        grid=(num_partials, steps),
        in_specs=[
            pl.BlockSpec((tile_rows, LANE), in_map),
            pl.BlockSpec((tile_rows, LANE), in_map),
        ],
        out_specs=pl.BlockSpec((SUBLANE, LANE), lambda c, r: (c, 0)),
        compiler_params=pltpu.CompilerParams(
            dimension_semantics=("parallel", "arbitrary"),
            vmem_limit_bytes=vmem_limit,
        ),
        cost_estimate=cost,
    )(x2, h2)

    # Final cross-lane/sublane reduce of a few KiB: trivial XLA op.
    return jnp.sum(partials).reshape(1)


def stimulus_rnn_fb_forward(
    input_state: jax.Array,
    hidden_state: jax.Array,
    use_pallas: bool | None = None,
    tile_rows: int | None = None,
    num_partials: int | None = None,
) -> jax.Array:
    """Equivalent of stimulus_rnn_fb_network.forward -> shape (1,)."""
    assert input_state.shape == hidden_state.shape
    n = input_state.shape[0]

    if use_pallas is None:
        use_pallas = n >= _PALLAS_MIN_N

    if not use_pallas:
        # For tiny N the pallas_call fixed cost dominates; let XLA fuse this
        # dot product into surrounding work instead.
        return jnp.sum((input_state * hidden_state)[None, :], axis=1)

    out_dtype = jnp.result_type(input_state.dtype, hidden_state.dtype)
    return _pallas_dot(input_state, hidden_state,
                       tile_rows_max=tile_rows,
                       num_partials=num_partials).astype(out_dtype)


def init_params(input_size: int, hidden_size: int):
    """Deterministic init of hh_cor / hh_inc (nn.Linear(in+hid, hid)).

    Unused by forward(); provided only for shape fidelity with __init__.
    """
    key = jax.random.PRNGKey(42)
    k1, k2, k3, k4 = jax.random.split(key, 4)
    fan_in = input_size + hidden_size
    bound = 1.0 / jnp.sqrt(fan_in)
    return {
        "hh_cor": {
            "w": jax.random.uniform(k1, (hidden_size, fan_in), jnp.float32, -bound, bound),
            "b": jax.random.uniform(k2, (hidden_size,), jnp.float32, -bound, bound),
        },
        "hh_inc": {
            "w": jax.random.uniform(k3, (hidden_size, fan_in), jnp.float32, -bound, bound),
            "b": jax.random.uniform(k4, (hidden_size,), jnp.float32, -bound, bound),
        },
    }


if __name__ == "__main__":
    input_size = 32
    hidden_size = 32

    key = jax.random.PRNGKey(0)
    kx, kh = jax.random.split(key)
    input_state = jax.random.normal(kx, (input_size,), jnp.float32)
    hidden_state = jax.random.normal(kh, (hidden_size,), jnp.float32)

    _params = init_params(input_size, hidden_size)  # unused by forward

    ref_small = jnp.sum((input_state * hidden_state)[None, :], axis=1)

    # 1) Default wrapper path (tiny N -> fused jnp, per perf feedback).
    out_auto = jax.block_until_ready(stimulus_rnn_fb_forward(input_state, hidden_state))
    assert out_auto.shape == (1,)
    assert jnp.allclose(out_auto, ref_small, atol=1e-5, rtol=1e-5), (out_auto, ref_small)

    # 2) Pallas kernel at the module's shape (single (8,128) tile, tiny pad).
    out_pk = jax.block_until_ready(
        stimulus_rnn_fb_forward(input_state, hidden_state, use_pallas=True))
    assert out_pk.shape == (1,)
    assert jnp.allclose(out_pk, ref_small, atol=1e-5, rtol=1e-5), (out_pk, ref_small)

    # 3) Unaligned N, forced small tiles + 2-way partial split: exercises
    #    ragged-tail masking, OOB-tile clamping, and the leading "parallel"
    #    axis (serial but correct on 1-TC chips, sharded across TCs on v7x).
    n_mid = 5000
    kx2, kh2 = jax.random.split(jax.random.PRNGKey(1))
    xm = jax.random.normal(kx2, (n_mid,), jnp.float32)
    hm = jax.random.normal(kh2, (n_mid,), jnp.float32)
    ref_mid = jnp.sum(xm * hm).reshape(1)
    out_mid = jax.block_until_ready(
        stimulus_rnn_fb_forward(xm, hm, use_pallas=True, tile_rows=8, num_partials=2))
    assert out_mid.shape == (1,)
    assert jnp.allclose(out_mid, ref_mid, atol=5e-3, rtol=1e-4), (out_mid, ref_mid)

    # 4) Large, 128-aligned N: no pad, free reshape.  (a) chip-default tiles;
    #    (b) forced odd tile -> partial last DMA block masked in-kernel.
    n_big = 4688 * 128
    kx3, kh3 = jax.random.split(jax.random.PRNGKey(2))
    xb = jax.random.normal(kx3, (n_big,), jnp.float32)
    hb = jax.random.normal(kh3, (n_big,), jnp.float32)
    ref_big = float(np.asarray(xb, np.float64) @ np.asarray(hb, np.float64))
    out_big_a = jax.block_until_ready(stimulus_rnn_fb_forward(xb, hb, use_pallas=True))
    out_big_b = jax.block_until_ready(
        stimulus_rnn_fb_forward(xb, hb, use_pallas=True, tile_rows=1000))
    assert out_big_a.shape == (1,) and out_big_b.shape == (1,)
    assert abs(float(out_big_a[0]) - ref_big) < 1.0, (out_big_a, ref_big)
    assert abs(float(out_big_b[0]) - ref_big) < 1.0, (out_big_b, ref_big)

    # 5) bf16 inputs: native-dtype DMA, in-kernel f32 upcast.
    xbf = xm.astype(jnp.bfloat16)
    hbf = hm.astype(jnp.bfloat16)
    ref_bf = jnp.sum(xbf.astype(jnp.float32) * hbf.astype(jnp.float32)).reshape(1)
    out_bf = jax.block_until_ready(stimulus_rnn_fb_forward(xbf, hbf, use_pallas=True))
    assert out_bf.shape == (1,)
    assert jnp.allclose(out_bf.astype(jnp.float32), ref_bf, atol=1e-2, rtol=1e-2), (out_bf, ref_bf)

    print("KERNEL_OK")
</pallas_src>

<mosaic_0001>
module attributes {stable_mosaic.version = 11 : i64} {
  func.func @kernel(%arg0: i32, %arg1: i32, %arg2: memref<8x128xf32, #tpu.memory_space<vmem>>, %arg3: memref<8x128xf32, #tpu.memory_space<vmem>>, %arg4: memref<8x128xf32, #tpu.memory_space<vmem>>) attributes {dimension_semantics = [#tpu.dimension_semantics<parallel>, #tpu.dimension_semantics<arbitrary>], iteration_bounds = array<i64: 1, 1>, scalar_prefetch = 0 : i64, scratch_operands = 0 : i64, tpu.core_type = #tpu.core_type<tc>, window_params = [{transform_indices = @transform_0, window_bounds = array<i64: 8, 128>}, {transform_indices = @transform_1, window_bounds = array<i64: 8, 128>}, {transform_indices = @transform_2, window_bounds = array<i64: 8, 128>}]} {
    %c0_i32 = arith.constant 0 : i32
    %0 = arith.cmpi eq, %arg1, %c0_i32 : i32
    %1 = arith.extui %0 : i1 to i32
    %c0_i32_0 = arith.constant 0 : i32
    %2 = arith.cmpi ne, %1, %c0_i32_0 : i32
    scf.if %2 {
      %cst_8 = arith.constant 0.000000e+00 : f32
      %11 = vector.broadcast %cst_8 : f32 to vector<8x128xf32>
      %c0_9 = arith.constant 0 : index
      %c0_10 = arith.constant 0 : index
      %12 = vector.load %arg4[%c0_9, %c0_10] : memref<8x128xf32, #tpu.memory_space<vmem>>, vector<8x128xf32>
      tpu.vector_store %arg4[%c0_9, %c0_10], %11 {strides = array<i32>} : memref<8x128xf32, #tpu.memory_space<vmem>>, vector<8x128xf32>,
    } else {
    }
    %c0 = arith.constant 0 : index
    %c0_1 = arith.constant 0 : index
    %3 = vector.load %arg2[%c0, %c0_1] : memref<8x128xf32, #tpu.memory_space<vmem>>, vector<8x128xf32>
    %c0_2 = arith.constant 0 : index
    %c0_3 = arith.constant 0 : index
    %4 = vector.load %arg3[%c0_2, %c0_3] : memref<8x128xf32, #tpu.memory_space<vmem>>, vector<8x128xf32>
    %5 = arith.mulf %3, %4 : vector<8x128xf32>
    %c0_4 = arith.constant 0 : index
    %c0_5 = arith.constant 0 : index
    %6 = vector.load %arg4[%c0_4, %c0_5] : memref<8x128xf32, #tpu.memory_space<vmem>>, vector<8x128xf32>
    %7 = vector.shape_cast %5 : vector<8x128xf32> to vector<1x8x128xf32>
    %cst = arith.constant dense<0.000000e+00> : vector<8x128xf32>
    %8 = vector.multi_reduction <add>, %7, %cst [0] : vector<1x8x128xf32> to vector<8x128xf32>
    %9 = arith.addf %6, %8 : vector<8x128xf32>
    %c0_6 = arith.constant 0 : index
    %c0_7 = arith.constant 0 : index
    %10 = vector.load %arg4[%c0_6, %c0_7] : memref<8x128xf32, #tpu.memory_space<vmem>>, vector<8x128xf32>
    tpu.vector_store %arg4[%c0_6, %c0_7], %9 {strides = array<i32>} : memref<8x128xf32, #tpu.memory_space<vmem>>, vector<8x128xf32>,
    return
  }
  func.func @transform_0(%arg0: i32, %arg1: i32) -> (i32, i32) {
    %c1_i32 = arith.constant 1 : i32
    %0 = arith.muli %arg0, %c1_i32 : i32
    %1 = arith.addi %0, %arg1 : i32
    %c0_i32 = arith.constant 0 : i32
    %2 = arith.minsi %1, %c0_i32 : i32
    %c0_i32_0 = arith.constant 0 : i32
    %c0_i32_1 = arith.constant 0 : i32
    return %2, %c0_i32_0 : i32, i32
  }
  func.func @transform_1(%arg0: i32, %arg1: i32) -> (i32, i32) {
    %c1_i32 = arith.constant 1 : i32
    %0 = arith.muli %arg0, %c1_i32 : i32
    %1 = arith.addi %0, %arg1 : i32
    %c0_i32 = arith.constant 0 : i32
    %2 = arith.minsi %1, %c0_i32 : i32
    %c0_i32_0 = arith.constant 0 : i32
    %c0_i32_1 = arith.constant 0 : i32
    return %2, %c0_i32_0 : i32, i32
  }
  func.func @transform_2(%arg0: i32, %arg1: i32) -> (i32, i32) {
    %c0_i32 = arith.constant 0 : i32
    %c0_i32_0 = arith.constant 0 : i32
    return %arg0, %c0_i32 : i32, i32
  }
}

</mosaic_0001>

<bundles_post_ra>
// kernel: tpu_custom_call.1
= control target key start
LH: loop header
LB: loop body
LE: loop exit
PB: predicated region body
PF: predicated region fallthrough
CT: control target
= control target key end

     0   :  { %7 = vsyncpa [#allocation3], 0  ;;  %s214_s0 = inlined_call_operand.hbm [shape: f32[8,128], index: 0, kind: input, shape index: {}]   ;;  %s215_s1 = inlined_call_operand.hbm [shape: f32[8,128], index: 1, kind: input, shape index: {}]   ;;  %s216_s2 = inlined_call_operand.hbm [shape: f32[8,128], index: 2, kind: output, shape index: {}]  }
   0x1   :  { %8 = vsyncpa [#allocation6], 0 }
   0x2   :  { %9 = vsyncpa [#allocation4], 0  ;;  %s160_s9 = smov [#allocation2]   ;;  %s161_s11 = smov [#allocation5]  }
   0x3   :  { %s21_s10 = sshll.u32 %s160_s9, 4  ;;  %s36_s12 = sshll.u32 %s161_s11, 4  ;;  %s22_s10 = int_to_ptr.vmem [resolvable:$true] %s21_s10  ;;  %s37_s12 = int_to_ptr.vmem [resolvable:$true] %s36_s12 }
   0x4   :  { %s88_s15 = scalar_lea.hbm %s214_s0, 128 }
   0x5   :  { %p89_p0 = scmp.ne.s32.totalorder %s214_s0, %s88_s15  ;;  %p92_p1 = scmp.lt.u32.totalorder %s88_s15, %s214_s0 }
   0x7   :  { %p94_p2 = pnand %p92_p1, %p89_p0 }
   0x9   :  { %97 = shalt.err (!%p94_p2)
}
   0xa   :  { %s98_s20 = scalar_lea.vmem %s22_s10, 128  ;;  %p103_p4 = scmp.lt.s32.totalorder %s22_s10, %s22_s10 }
   0xb   :  { %p99_p3 = scmp.ne.s32.totalorder %s22_s10, %s98_s20  ;;  %p104_p5 = scmp.lt.s32.totalorder %s98_s20, %s98_s20 }
   0xd   :  { %p105_p6 = por %p104_p5, %p103_p4 }
   0xf   :  { %p106_p7 = pnand %p105_p6, %p99_p3 }
  0x11   :  { %109 = shalt.err (!%p106_p7)
}
  0x12   :  { %24 = dma.hbm_to_vmem [thread:$0]  %s214_s0, 128, %s22_s10, [#allocation3]  }
  0x13   :  { %s110_s25 = scalar_lea.hbm %s215_s1, 128 }
  0x14   :  { %p111_p8 = scmp.ne.s32.totalorder %s215_s1, %s110_s25  ;;  %p114_p9 = scmp.lt.u32.totalorder %s110_s25, %s215_s1 }
  0x16   :  { %p116_p10 = pnand %p114_p9, %p111_p8 }
  0x18   :  { %119 = shalt.err (!%p116_p10)
}
  0x19   :  { %s120_s30 = scalar_lea.vmem %s37_s12, 128  ;;  %p125_p12 = scmp.lt.s32.totalorder %s37_s12, %s37_s12 }
  0x1a   :  { %p121_p11 = scmp.ne.s32.totalorder %s37_s12, %s120_s30  ;;  %p126_p13 = scmp.lt.s32.totalorder %s120_s30, %s120_s30 }
  0x1c   :  { %p127_p0 = por %p126_p13, %p125_p12 }
  0x1e   :  { %p128_p1 = pnand %p127_p0, %p121_p11 }
  0x20   :  { %131 = shalt.err (!%p128_p1)
}
  0x21   :  { %39 = dma.hbm_to_vmem [thread:$0]  %s215_s1, 128, %s37_s12, [#allocation6]  }
  0x22   :  { %154 = dma.done.wait [#allocation3], 128  }
  0x23   :  { %155 = vsyncadd [#allocation3], 4294967168 }
  0x24   :  { %156 = dma.done.wait [#allocation6], 128  }
  0x25   :  { %157 = vsyncadd [#allocation6], 4294967168  ;;  %v57_v0 = vld [vmem:[#allocation2] sm:$0xff]  ;;  %v58_v1 = vld [vmem:[#allocation5] sm:$0xff]  ;;  %s162_s4 = smov [#allocation7]  }
  0x26   :  { %s70_s5 = sshll.u32 %s162_s4, 4  ;;  %v59_v2 = vmul.f32 %v58_v1, %v57_v0  ;;  %s71_s5 = int_to_ptr.vmem [resolvable:$true] %s70_s5 }
  0x27   :  { %s132_s6 = scalar_lea.vmem %s71_s5, 128  ;;  %p137_p3 = scmp.lt.s32.totalorder %s71_s5, %s71_s5 }
  0x28   :  { %63 = vst [vmem:[#allocation7] sm:$0xff] %v59_v2  ;;  %p133_p2 = scmp.ne.s32.totalorder %s71_s5, %s132_s6  ;;  %p138_p4 = scmp.lt.s32.totalorder %s132_s6, %s132_s6 }
  0x2a   :  { %p139_p5 = por %p138_p4, %p137_p3 }
  0x2c   :  { %p140_p6 = pnand %p139_p5, %p133_p2 }
  0x2e   :  { %143 = shalt.err (!%p140_p6)
}
  0x2f   :  { %s144_s8 = scalar_lea.hbm %s216_s2, 128 }
  0x30   :  { %p145_p7 = scmp.ne.s32.totalorder %s216_s2, %s144_s8  ;;  %p148_p8 = scmp.lt.u32.totalorder %s144_s8, %s216_s2 }
  0x32   :  { %p150_p9 = pnand %p148_p8, %p145_p7 }
  0x34   :  { %153 = shalt.err (!%p150_p9)
}
  0x35   :  { %73 = dma.vmem_to_hbm [thread:$0]  %s71_s5, 128, %s216_s2, [#allocation4]  }
  0x36   :  { %158 = dma.done.wait [#allocation4], 128  }
  0x37   :  { %159 = vsyncadd [#allocation4], 4294967168 }
  0x38   :  { %77 = vsyncpa [#allocation3], 1 }
  0x39   :  { %78 = vsyncpa [#allocation6], 1 }
  0x3a   :  { %79 = vsyncpa [#allocation4], 1 }

</bundles_post_ra>
